<compile_context>
chip_gen: v6e
topology: v6e:2x2x1
jax: 0.10.0
libtpu: 0.0.40
codegen_flags: <defaults>
</compile_context>

<pallas_src>
import jax
import jax.numpy as jnp
from jax.experimental import pallas as pl
from jax.experimental.pallas import tpu as pltpu

LANE = 128


def _round_up(x: int, m: int) -> int:
    return ((x + m - 1) // m) * m


def _pick_batch_tile(n: int) -> int:
    """Batch tile: big for throughput, >=2 grid steps for v7x dual-TC, 8-aligned."""
    max_tb = 512  # ~8.5 MiB total VMEM at this tile -> safe under v5e/v6e/v7x defaults
    if n >= 2 * max_tb:
        return max_tb
    if n > 8:
        # Split into at least two tiles so the "parallel" axis can use both v7x cores.
        return _round_up((n + 1) // 2, 8)
    return _round_up(max(n, 1), 8)


def mlp_kernel(x_ref, w1_ref, b1_ref, w2_ref, b2_ref, w3_ref, b3_ref, o_ref):
    # x_ref: (TB, 784) f32 ; wK_ref: (in, out) in MXU dtype (bf16) ; bK_ref: (1, out) f32.
    mxu_dtype = w1_ref.dtype
    x = x_ref[...].astype(mxu_dtype)

    h1 = jnp.dot(x, w1_ref[...], preferred_element_type=jnp.float32) + b1_ref[...]
    h1 = jnp.maximum(h1, 0.0)

    h2 = jnp.dot(h1.astype(mxu_dtype), w2_ref[...],
                 preferred_element_type=jnp.float32) + b2_ref[...]
    h2 = jnp.maximum(h2, 0.0)

    logits = jnp.dot(h2.astype(mxu_dtype), w3_ref[...],
                     preferred_element_type=jnp.float32) + b3_ref[...]

    # Numerically stable softmax over the lane (class) axis.  Padded classes carry a
    # -1e30 bias, so exp underflows to exactly 0 and they do not perturb the result.
    m = jnp.max(logits, axis=-1, keepdims=True)
    e = jnp.exp(logits - m)
    s = jnp.sum(e, axis=-1, keepdims=True)
    o_ref[...] = (e * pl.reciprocal(s, approx=True)).astype(o_ref.dtype)


def prepare_params(w1, b1, w2, b2, w3, b3, mxu_dtype=jnp.bfloat16):
    """One-time weight prep: transpose to (in, out), pad feature dims to 128 multiples,
    cast matmul operands to the MXU dtype.  Call once at init, reuse every forward."""
    d_in, h1_dim, h2_dim, n_cls = w1.shape[1], w1.shape[0], w2.shape[0], w3.shape[0]
    d1 = _round_up(h1_dim, LANE)   # 256
    d2 = _round_up(h2_dim, LANE)   # 256
    d3 = _round_up(n_cls, LANE)    # 128
    f32 = jnp.float32

    wt1 = jnp.zeros((d_in, d1), f32).at[:, :h1_dim].set(w1.T.astype(f32)).astype(mxu_dtype)
    b1p = jnp.zeros((1, d1), f32).at[0, :h1_dim].set(b1.astype(f32))
    wt2 = jnp.zeros((d1, d2), f32).at[:h1_dim, :h2_dim].set(w2.T.astype(f32)).astype(mxu_dtype)
    b2p = jnp.zeros((1, d2), f32).at[0, :h2_dim].set(b2.astype(f32))
    wt3 = jnp.zeros((d2, d3), f32).at[:h2_dim, :n_cls].set(w3.T.astype(f32)).astype(mxu_dtype)
    # Padded classes get a huge negative bias -> softmax weight exactly 0.
    b3p = jnp.full((1, d3), -1e30, f32).at[0, :n_cls].set(b3.astype(f32))

    return {"wt1": wt1, "b1": b1p, "wt2": wt2, "b2": b2p, "wt3": wt3, "b3": b3p,
            "d_in": d_in, "n_classes": n_cls}


def classifier_forward(x, params):
    """x: (N, 784) f32 (or bf16); params from prepare_params -> (N, 10) f32 probs."""
    n, d_in = x.shape
    assert d_in == params["d_in"], (d_in, params["d_in"])
    d1 = params["wt1"].shape[1]
    d2 = params["wt2"].shape[1]
    d3 = params["wt3"].shape[1]

    tb = _pick_batch_tile(n)
    grid = (pl.cdiv(n, tb),)

    out = pl.pallas_call(
        mlp_kernel,
        out_shape=jax.ShapeDtypeStruct((n, d3), jnp.float32),
        grid_spec=pltpu.PrefetchScalarGridSpec(
            num_scalar_prefetch=0,
            grid=grid,
            in_specs=[
                pl.BlockSpec((tb, d_in), lambda i: (i, 0)),   # x streams over batch
                pl.BlockSpec((d_in, d1), lambda i: (0, 0)),   # W1^T (bf16) resident
                pl.BlockSpec((1, d1), lambda i: (0, 0)),      # b1 (f32)
                pl.BlockSpec((d1, d2), lambda i: (0, 0)),     # W2^T resident
                pl.BlockSpec((1, d2), lambda i: (0, 0)),      # b2
                pl.BlockSpec((d2, d3), lambda i: (0, 0)),     # W3^T resident
                pl.BlockSpec((1, d3), lambda i: (0, 0)),      # b3 (padded classes -1e30)
            ],
            out_specs=pl.BlockSpec((tb, d3), lambda i: (i, 0)),  # lane-dense 128-wide
        ),
        compiler_params=pltpu.CompilerParams(
            dimension_semantics=("parallel",),
        ),
    )(x, params["wt1"], params["b1"], params["wt2"], params["b2"],
      params["wt3"], params["b3"])

    return out[:, :params["n_classes"]]


def _reference(x, w1, b1, w2, b2, w3, b3, mxu_dtype=jnp.float32):
    c = lambda a: a.astype(mxu_dtype)
    h1 = jnp.maximum(jnp.dot(c(x), c(w1).T, preferred_element_type=jnp.float32) + b1, 0.0)
    h2 = jnp.maximum(jnp.dot(c(h1), c(w2).T, preferred_element_type=jnp.float32) + b2, 0.0)
    logits = jnp.dot(c(h2), c(w3).T, preferred_element_type=jnp.float32) + b3
    return jax.nn.softmax(logits, axis=1)


if __name__ == "__main__":
    key = jax.random.PRNGKey(0)
    keys = jax.random.split(key, 7)

    in_features, hidden, n_classes = 28 * 28, 200, 10
    batch = 8

    def _init_linear(kw, kb, fan_in, fan_out):
        # PyTorch nn.Linear default init: U(-1/sqrt(fan_in), 1/sqrt(fan_in))
        bound = 1.0 / (fan_in ** 0.5)
        w = jax.random.uniform(kw, (fan_out, fan_in), jnp.float32, -bound, bound)
        b = jax.random.uniform(kb, (fan_out,), jnp.float32, -bound, bound)
        return w, b

    w1, b1 = _init_linear(keys[0], keys[1], in_features, hidden)
    w2, b2 = _init_linear(keys[2], keys[3], hidden, hidden)
    w3, b3 = _init_linear(keys[4], keys[5], hidden, n_classes)

    x = jax.random.normal(keys[6], (batch, in_features), jnp.float32)

    params = prepare_params(w1, b1, w2, b2, w3, b3)          # one-time weight prep
    y = classifier_forward(x, params)
    y = jax.block_until_ready(y)

    # References: bf16-MXU reference (tight check) and pure-f32 reference (loose check,
    # tolerance relaxed because the kernel uses bf16 MXU operands + approx reciprocal).
    y_ref_bf16 = _reference(x, w1, b1, w2, b2, w3, b3, mxu_dtype=jnp.bfloat16)
    y_ref_f32 = _reference(x, w1, b1, w2, b2, w3, b3, mxu_dtype=jnp.float32)

    assert y.shape == (batch, n_classes), y.shape
    assert bool(jnp.all(jnp.isfinite(y)))
    # Rows are probability distributions (approx reciprocal -> ~1e-3 slack).
    assert jnp.allclose(jnp.sum(y, axis=1), 1.0, atol=5e-3)
    assert jnp.allclose(y, y_ref_bf16, atol=5e-3), float(jnp.max(jnp.abs(y - y_ref_bf16)))
    assert jnp.allclose(y, y_ref_f32, atol=3e-2), float(jnp.max(jnp.abs(y - y_ref_f32)))

    print("KERNEL_OK")
</pallas_src>

<mosaic_0001>
module attributes {stable_mosaic.version = 11 : i64} {
  func.func @mlp_kernel(%arg0: i32, %arg1: memref<8x784xf32, #tpu.memory_space<vmem>>, %arg2: memref<784x256xbf16, #tpu.memory_space<vmem>>, %arg3: memref<1x256xf32, #tpu.memory_space<vmem>>, %arg4: memref<256x256xbf16, #tpu.memory_space<vmem>>, %arg5: memref<1x256xf32, #tpu.memory_space<vmem>>, %arg6: memref<256x128xbf16, #tpu.memory_space<vmem>>, %arg7: memref<1x128xf32, #tpu.memory_space<vmem>>, %arg8: memref<8x128xf32, #tpu.memory_space<vmem>>) attributes {dimension_semantics = [#tpu.dimension_semantics<parallel>], iteration_bounds = array<i64: 1>, scalar_prefetch = 0 : i64, scratch_operands = 0 : i64, tpu.core_type = #tpu.core_type<tc>, window_params = [{transform_indices = @transform_0, window_bounds = array<i64: 8, 784>}, {pipeline_mode = #tpu.pipeline_mode<synchronous>, transform_indices = @transform_1, window_bounds = array<i64: 784, 256>}, {pipeline_mode = #tpu.pipeline_mode<synchronous>, transform_indices = @transform_2, window_bounds = array<i64: 1, 256>}, {pipeline_mode = #tpu.pipeline_mode<synchronous>, transform_indices = @transform_3, window_bounds = array<i64: 256, 256>}, {pipeline_mode = #tpu.pipeline_mode<synchronous>, transform_indices = @transform_4, window_bounds = array<i64: 1, 256>}, {pipeline_mode = #tpu.pipeline_mode<synchronous>, transform_indices = @transform_5, window_bounds = array<i64: 256, 128>}, {pipeline_mode = #tpu.pipeline_mode<synchronous>, transform_indices = @transform_6, window_bounds = array<i64: 1, 128>}, {transform_indices = @transform_7, window_bounds = array<i64: 8, 128>}]} {
    %c0 = arith.constant 0 : index
    %c0_0 = arith.constant 0 : index
    %0 = vector.load %arg1[%c0, %c0_0] : memref<8x784xf32, #tpu.memory_space<vmem>>, vector<8x784xf32>
    %1 = arith.truncf %0 : vector<8x784xf32> to vector<8x784xbf16>
    %c0_1 = arith.constant 0 : index
    %c0_2 = arith.constant 0 : index
    %2 = vector.load %arg2[%c0_1, %c0_2] : memref<784x256xbf16, #tpu.memory_space<vmem>>, vector<784x256xbf16>
    %cst = arith.constant dense<0.000000e+00> : vector<8x256xf32>
    %3 = tpu.matmul %1, %2, %cst {dimension_numbers = #tpu.dot_dimension_numbers<[1], [0], [0], [1], [0, 0, 1, 1], [], []>} : vector<8x784xbf16>, vector<784x256xbf16>, vector<8x256xf32> -> vector<8x256xf32>
    %c0_3 = arith.constant 0 : index
    %c0_4 = arith.constant 0 : index
    %4 = vector.load %arg3[%c0_3, %c0_4] : memref<1x256xf32, #tpu.memory_space<vmem>>, vector<1x256xf32>
    %5 = vector.broadcast %4 : vector<1x256xf32> to vector<8x256xf32>
    %6 = arith.addf %3, %5 : vector<8x256xf32>
    %cst_5 = arith.constant 0.000000e+00 : f32
    %7 = vector.broadcast %cst_5 : f32 to vector<8x256xf32>
    %8 = arith.maximumf %6, %7 : vector<8x256xf32>
    %9 = arith.truncf %8 : vector<8x256xf32> to vector<8x256xbf16>
    %c0_6 = arith.constant 0 : index
    %c0_7 = arith.constant 0 : index
    %10 = vector.load %arg4[%c0_6, %c0_7] : memref<256x256xbf16, #tpu.memory_space<vmem>>, vector<256x256xbf16>
    %cst_8 = arith.constant dense<0.000000e+00> : vector<8x256xf32>
    %11 = tpu.matmul %9, %10, %cst_8 {dimension_numbers = #tpu.dot_dimension_numbers<[1], [0], [0], [1], [0, 0, 1, 1], [], []>} : vector<8x256xbf16>, vector<256x256xbf16>, vector<8x256xf32> -> vector<8x256xf32>
    %c0_9 = arith.constant 0 : index
    %c0_10 = arith.constant 0 : index
    %12 = vector.load %arg5[%c0_9, %c0_10] : memref<1x256xf32, #tpu.memory_space<vmem>>, vector<1x256xf32>
    %13 = vector.broadcast %12 : vector<1x256xf32> to vector<8x256xf32>
    %14 = arith.addf %11, %13 : vector<8x256xf32>
    %cst_11 = arith.constant 0.000000e+00 : f32
    %15 = vector.broadcast %cst_11 : f32 to vector<8x256xf32>
    %16 = arith.maximumf %14, %15 : vector<8x256xf32>
    %17 = arith.truncf %16 : vector<8x256xf32> to vector<8x256xbf16>
    %c0_12 = arith.constant 0 : index
    %c0_13 = arith.constant 0 : index
    %18 = vector.load %arg6[%c0_12, %c0_13] : memref<256x128xbf16, #tpu.memory_space<vmem>>, vector<256x128xbf16>
    %cst_14 = arith.constant dense<0.000000e+00> : vector<8x128xf32>
    %19 = tpu.matmul %17, %18, %cst_14 {dimension_numbers = #tpu.dot_dimension_numbers<[1], [0], [0], [1], [0, 0, 1, 1], [], []>} : vector<8x256xbf16>, vector<256x128xbf16>, vector<8x128xf32> -> vector<8x128xf32>
    %c0_15 = arith.constant 0 : index
    %c0_16 = arith.constant 0 : index
    %20 = vector.load %arg7[%c0_15, %c0_16] : memref<1x128xf32, #tpu.memory_space<vmem>>, vector<1x128xf32>
    %21 = vector.broadcast %20 : vector<1x128xf32> to vector<8x128xf32>
    %22 = arith.addf %19, %21 : vector<8x128xf32>
    %cst_17 = arith.constant dense<0xFF800000> : vector<8xf32>
    %23 = vector.multi_reduction <maximumf>, %22, %cst_17 [1] : vector<8x128xf32> to vector<8xf32>
    %24 = vector.shape_cast %23 : vector<8xf32> to vector<8x1xf32>
    %25 = vector.broadcast %24 : vector<8x1xf32> to vector<8x128xf32>
    %26 = arith.subf %22, %25 : vector<8x128xf32>
    %27 = math.exp %26 : vector<8x128xf32>
    %cst_18 = arith.constant dense<0.000000e+00> : vector<8xf32>
    %28 = vector.multi_reduction <add>, %27, %cst_18 [1] : vector<8x128xf32> to vector<8xf32>
    %29 = vector.shape_cast %28 : vector<8xf32> to vector<8x1xf32>
    %30 = tpu.reciprocal %29 {approx = true} : vector<8x1xf32> -> vector<8x1xf32>
    %31 = vector.broadcast %30 : vector<8x1xf32> to vector<8x128xf32>
    %32 = arith.mulf %27, %31 : vector<8x128xf32>
    %c0_19 = arith.constant 0 : index
    %c0_20 = arith.constant 0 : index
    %33 = vector.load %arg8[%c0_19, %c0_20] : memref<8x128xf32, #tpu.memory_space<vmem>>, vector<8x128xf32>
    tpu.vector_store %arg8[%c0_19, %c0_20], %32 {strides = array<i32>} : memref<8x128xf32, #tpu.memory_space<vmem>>, vector<8x128xf32>,
    return
  }
  func.func @transform_0(%arg0: i32) -> (i32, i32) {
    %c0_i32 = arith.constant 0 : i32
    %c0_i32_0 = arith.constant 0 : i32
    return %arg0, %c0_i32 : i32, i32
  }
  func.func @transform_1(%arg0: i32) -> (i32, i32) {
    %c0_i32 = arith.constant 0 : i32
    %c0_i32_0 = arith.constant 0 : i32
    %c0_i32_1 = arith.constant 0 : i32
    return %c0_i32, %c0_i32_0 : i32, i32
  }
  func.func @transform_2(%arg0: i32) -> (i32, i32) {
    %c0_i32 = arith.constant 0 : i32
    %c0_i32_0 = arith.constant 0 : i32
    %c0_i32_1 = arith.constant 0 : i32
    return %c0_i32, %c0_i32_0 : i32, i32
  }
  func.func @transform_3(%arg0: i32) -> (i32, i32) {
    %c0_i32 = arith.constant 0 : i32
    %c0_i32_0 = arith.constant 0 : i32
    %c0_i32_1 = arith.constant 0 : i32
    return %c0_i32, %c0_i32_0 : i32, i32
  }
  func.func @transform_4(%arg0: i32) -> (i32, i32) {
    %c0_i32 = arith.constant 0 : i32
    %c0_i32_0 = arith.constant 0 : i32
    %c0_i32_1 = arith.constant 0 : i32
    return %c0_i32, %c0_i32_0 : i32, i32
  }
  func.func @transform_5(%arg0: i32) -> (i32, i32) {
    %c0_i32 = arith.constant 0 : i32
    %c0_i32_0 = arith.constant 0 : i32
    %c0_i32_1 = arith.constant 0 : i32
    return %c0_i32, %c0_i32_0 : i32, i32
  }
  func.func @transform_6(%arg0: i32) -> (i32, i32) {
    %c0_i32 = arith.constant 0 : i32
    %c0_i32_0 = arith.constant 0 : i32
    %c0_i32_1 = arith.constant 0 : i32
    return %c0_i32, %c0_i32_0 : i32, i32
  }
  func.func @transform_7(%arg0: i32) -> (i32, i32) {
    %c0_i32 = arith.constant 0 : i32
    %c0_i32_0 = arith.constant 0 : i32
    return %arg0, %c0_i32 : i32, i32
  }
}

</mosaic_0001>

<bundles_post_ra>
// kernel: tpu_custom_call.1
= control target key start
LH: loop header
LB: loop body
LE: loop exit
PB: predicated region body
PF: predicated region fallthrough
CT: control target
= control target key end

     0   :  { %12 = vsyncpa [#allocation3], 0  ;;  %s1895_s0 = inlined_call_operand.hbm [shape: f32[8,784], index: 0, kind: input, shape index: {}]   ;;  %s1896_s1 = inlined_call_operand.hbm [shape: bf16[784,256], index: 1, kind: input, shape index: {}]   ;;  %s1897_s2 = inlined_call_operand.vmem [shape: f32[1,256], index: 2, kind: input, shape index: {}]   ;;  %s1898_s3 = inlined_call_operand.hbm [shape: bf16[256,256], index: 3, kind: input, shape index: {}]   ;;  %s1899_s4 = inlined_call_operand.vmem [shape: f32[1,256], index: 4, kind: input, shape index: {}]   ;;  %s1900_s5 = inlined_call_operand.hbm [shape: bf16[256,128], index: 5, kind: input, shape index: {}]   ;;  %s1901_s6 = inlined_call_operand.vmem [shape: f32[1,128], index: 6, kind: input, shape index: {}]   ;;  %s1902_s7 = inlined_call_operand.hbm [shape: f32[8,128], index: 7, kind: output, shape index: {}]  }
   0x1   :  { %13 = vsyncpa [#allocation6], 0 }
   0x2   :  { %14 = vsyncpa [#allocation9], 0 }
   0x3   :  { %15 = vsyncpa [#allocation4], 0  ;;  %s1821_s24 = smov [#allocation5]  }
   0x4   :  { %s31_s25 = sshll.u32 %s1821_s24, 4  ;;  %s32_s25 = int_to_ptr.vmem [resolvable:$true] %s31_s25 }
   0x5   :  { %s1721_s26 = scalar_lea.vmem %s32_s25, 12544  ;;  %p1726_p1 = scmp.lt.s32.totalorder %s32_s25, %s32_s25 }
   0x6   :  { %p1722_p0 = scmp.ne.s32.totalorder %s32_s25, %s1721_s26  ;;  %p1727_p2 = scmp.lt.s32.totalorder %s1721_s26, %s1721_s26 }
   0x8   :  { %p1728_p3 = por %p1727_p2, %p1726_p1 }
   0xa   :  { %p1729_p4 = pnand %p1728_p3, %p1722_p0 }
   0xc   :  { %1732 = shalt.err (!%p1729_p4)
}
   0xd   :  { %s1822_s27 = smov 128   ;;  %s1823_s28 = smov 8  }
   0xe   :  { %37 = dma.hbm_to_vmem [thread:$0]  %s1896_s1, 12544, %s32_s25, [#allocation6], %s1822_s27, %s1822_s27, %s1823_s28  }
   0xf   :  { %s1824_s8 = smov [#allocation2]   ;;  %s1825_s10 = smov [#allocation7]  }
  0x10   :  { %s22_s9 = sshll.u32 %s1824_s8, 4  ;;  %s45_s11 = sshll.u32 %s1825_s10, 4  ;;  %s23_s9 = int_to_ptr.vmem [resolvable:$true] %s22_s9  ;;  %s46_s11 = int_to_ptr.vmem [resolvable:$true] %s45_s11 }
  0x11   :  { %s1741_s12 = scalar_lea.vmem %s23_s9, 896  ;;  %p1746_p6 = scmp.lt.s32.totalorder %s23_s9, %s23_s9 }
  0x12   :  { %p1742_p5 = scmp.ne.s32.totalorder %s23_s9, %s1741_s12  ;;  %p1747_p7 = scmp.lt.s32.totalorder %s1741_s12, %s1741_s12 }
  0x14   :  { %p1748_p8 = por %p1747_p7, %p1746_p6 }
  0x16   :  { %p1749_p9 = pnand %p1748_p8, %p1742_p5 }
  0x18   :  { %1752 = shalt.err (!%p1749_p9)
}
  0x19   :  { %25 = dma.hbm_to_vmem [thread:$0]  %s1895_s0, 896, %s23_s9, [#allocation3]  }
  0x1a   :  { %s1761_s15 = scalar_lea.vmem %s46_s11, 4096  ;;  %p1766_p11 = scmp.lt.s32.totalorder %s46_s11, %s46_s11 }
  0x1b   :  { %p1762_p10 = scmp.ne.s32.totalorder %s46_s11, %s1761_s15  ;;  %p1767_p12 = scmp.lt.s32.totalorder %s1761_s15, %s1761_s15 }
  0x1d   :  { %p1768_p13 = por %p1767_p12, %p1766_p11 }
  0x1f   :  { %p1769_p0 = pnand %p1768_p13, %p1762_p10 }
  0x21   :  { %1772 = shalt.err (!%p1769_p0)
}
  0x22   :  { %51 = dma.hbm_to_vmem [thread:$0]  %s1898_s3, 4096, %s46_s11, [#allocation6], %s1822_s27, %s1822_s27, %s1823_s28  }
  0x23   :  { %s1826_s17 = smov [#allocation8]  }
  0x24   :  { %s59_s18 = sshll.u32 %s1826_s17, 4  ;;  %s60_s18 = int_to_ptr.vmem [resolvable:$true] %s59_s18 }
  0x25   :  { %s1781_s19 = scalar_lea.vmem %s60_s18, 2048  ;;  %p1786_p2 = scmp.lt.s32.totalorder %s60_s18, %s60_s18 }
  0x26   :  { %p1782_p1 = scmp.ne.s32.totalorder %s60_s18, %s1781_s19  ;;  %p1787_p3 = scmp.lt.s32.totalorder %s1781_s19, %s1781_s19 }
  0x28   :  { %p1788_p4 = por %p1787_p3, %p1786_p2 }
  0x2a   :  { %p1789_p5 = pnand %p1788_p4, %p1782_p1 }
  0x2c   :  { %1792 = shalt.err (!%p1789_p5)
}
  0x2d   :  { %s1827_s0 = smov 64   ;;  %s1828_s20 = smov 4  }
  0x2e   :  { %65 = dma.hbm_to_vmem [thread:$0]  %s1900_s5, 2048, %s60_s18, [#allocation9], %s1827_s0, %s1827_s0, %s1828_s20  }
  0x2f   :  { %1813 = dma.done.wait [#allocation3], 896  }
  0x30   :  { %1814 = vsyncadd [#allocation3], 4294966400 }
  0x31   :  { %1815 = dma.done.wait [#allocation6], 16640  }
  0x32   :  { %1816 = vsyncadd [#allocation6], 4294950656 }
  0x33   :  { %1817 = dma.done.wait [#allocation9], 2048  }
  0x34   :  { %1818 = vsyncadd [#allocation9], 4294965248  ;;  %v1498_v0 = vld [vmem:[#allocation5 + $0x74] ss:$8 sps:$4 sm:$0xff]   ;;  %v1500_v1 = vld [vmem:[#allocation5 + $0x70] ss:$8 sps:$4 sm:$0xff]  }
  0x35   :  { %699 = vmatprep.subr.bf16.mxu0 %v1498_v0  ;;  %v1501_v2 = vld [vmem:[#allocation5 + $0x174] ss:$8 sps:$4 sm:$0xff]   ;;  %v1503_v3 = vld [vmem:[#allocation5 + $0x170] ss:$8 sps:$4 sm:$0xff]   ;;  %v1504_v4 = vld [vmem:[#allocation5 + $0x64] ss:$8 sps:$4 sm:$0xff]  }
  0x36   :  { %700 = vmatpush1.bf16.msra.mxu0 %v1500_v1  ;;  %v1506_v5 = vld [vmem:[#allocation5 + $0x60] ss:$8 sps:$4 sm:$0xff]   ;;  %740 = vmatprep.subr.bf16.mxu1 %v1501_v2  ;;  %v1507_v6 = vld [vmem:[#allocation5 + $0x164] ss:$8 sps:$4 sm:$0xff]   ;;  %v1510_v8 = vld [vmem:[#allocation5 + $0x54] ss:$8 sps:$4 sm:$0xff]  }
  0x37   :  { %741 = vmatpush1.bf16.msra.mxu1 %v1503_v3  ;;  %701 = vmatprep.subr.bf16.mxu0 %v1504_v4  ;;  %v1509_v7 = vld [vmem:[#allocation5 + $0x160] ss:$8 sps:$4 sm:$0xff]   ;;  %v1512_v9 = vld [vmem:[#allocation5 + $0x50] ss:$8 sps:$4 sm:$0xff]   ;;  %v1513_v10 = vld [vmem:[#allocation5 + $0x154] ss:$8 sps:$4 sm:$0xff]  }
  0x38   :  { %742 = vmatprep.subr.bf16.mxu1 %v1507_v6  ;;  %v1516_v11 = vld [vmem:[#allocation5 + $0x44] ss:$8 sps:$4 sm:$0xff]   ;;  %v1515_v12 = vld [vmem:[#allocation5 + $0x150] ss:$8 sps:$4 sm:$0xff]   ;;  %v1518_v14 = vld [vmem:[#allocation5 + $0x40] ss:$8 sps:$4 sm:$0xff]  }
  0x39   :  { %v1519_v13 = vld [vmem:[#allocation5 + $0x144] ss:$8 sps:$4 sm:$0xff]   ;;  %v1522_v15 = vld [vmem:[#allocation5 + $0x34] ss:$8 sps:$4 sm:$0xff]   ;;  %v1521_v16 = vld [vmem:[#allocation5 + $0x140] ss:$8 sps:$4 sm:$0xff]  }
  0x3a   :  { %702 = vmatpush1.bf16.msra.mxu0 %v1506_v5  ;;  %v1525_v17 = vld [vmem:[#allocation5 + $0x134] ss:$8 sps:$4 sm:$0xff]   ;;  %v1524_v18 = vld [vmem:[#allocation5 + $0x30] ss:$8 sps:$4 sm:$0xff]   ;;  %v1528_v19 = vld [vmem:[#allocation5 + $0x24] ss:$8 sps:$4 sm:$0xff]  }
  0x3b   :  { %703 = vmatprep.subr.bf16.mxu0 %v1510_v8  ;;  %743 = vmatpush1.bf16.msra.mxu1 %v1509_v7  ;;  %v1527_v20 = vld [vmem:[#allocation5 + $0x130] ss:$8 sps:$4 sm:$0xff]   ;;  %v1531_v21 = vld [vmem:[#allocation5 + $0x124] ss:$8 sps:$4 sm:$0xff]   ;;  %v1530_v22 = vld [vmem:[#allocation5 + $0x20] ss:$8 sps:$4 sm:$0xff]  }
  0x3c   :  { %744 = vmatprep.subr.bf16.mxu1 %v1513_v10  ;;  %v1534_v23 = vld [vmem:[#allocation5 + $0x14] ss:$8 sps:$4 sm:$0xff]   ;;  %v1533_v24 = vld [vmem:[#allocation5 + $0x120] ss:$8 sps:$4 sm:$0xff]   ;;  %v1536_v26 = vld [vmem:[#allocation5 + $0x10] ss:$8 sps:$4 sm:$0xff]  }
  0x3d   :  { %v1537_v25 = vld [vmem:[#allocation5 + $0x114] ss:$8 sps:$4 sm:$0xff]   ;;  %v1540_v27 = vld [vmem:[#allocation5 + $0x4] ss:$8 sps:$4 sm:$0xff]   ;;  %v1539_v28 = vld [vmem:[#allocation5 + $0x110] ss:$8 sps:$4 sm:$0xff]  }
  0x3e   :  { %704 = vmatpush1.bf16.msra.mxu0 %v1512_v9  ;;  %v1543_v29 = vld [vmem:[#allocation5 + $0x104] ss:$8 sps:$4 sm:$0xff]   ;;  %v1542_v30 = vld [vmem:[#allocation5] ss:$8 sps:$4 sm:$0xff]   ;;  %v1546_v31 = vld [vmem:[#allocation5 + $0xf4] ss:$8 sps:$4 sm:$0xff]  }
  0x3f   :  { %705 = vmatprep.subr.bf16.mxu0 %v1516_v11  ;;  %745 = vmatpush1.bf16.msra.mxu1 %v1515_v12  ;;  %v1545_v32 = vld [vmem:[#allocation5 + $0x100] ss:$8 sps:$4 sm:$0xff]   ;;  %v1549_v33 = vld [vmem:[#allocation5 + $0x1f4] ss:$8 sps:$4 sm:$0xff]   ;;  %v1548_v34 = vld [vmem:[#allocation5 + $0xf0] ss:$8 sps:$4 sm:$0xff]  }
  0x40   :  { %746 = vmatprep.subr.bf16.mxu1 %v1519_v13  ;;  %v1552_v35 = vld [vmem:[#allocation5 + $0xe4] ss:$8 sps:$4 sm:$0xff]   ;;  %v1551_v36 = vld [vmem:[#allocation5 + $0x1f0] ss:$8 sps:$4 sm:$0xff]   ;;  %v1554_v38 = vld [vmem:[#allocation5 + $0xe0] ss:$8 sps:$4 sm:$0xff]  }
  0x41   :  { %v1555_v37 = vld [vmem:[#allocation5 + $0x1e4] ss:$8 sps:$4 sm:$0xff]   ;;  %v1558_v39 = vld [vmem:[#allocation5 + $0xd4] ss:$8 sps:$4 sm:$0xff]   ;;  %v1557_v40 = vld [vmem:[#allocation5 + $0x1e0] ss:$8 sps:$4 sm:$0xff]  }
  0x42   :  { %706 = vmatpush1.bf16.msra.mxu0 %v1518_v14  ;;  %v1561_v41 = vld [vmem:[#allocation5 + $0x1d4] ss:$8 sps:$4 sm:$0xff]   ;;  %v1560_v42 = vld [vmem:[#allocation5 + $0xd0] ss:$8 sps:$4 sm:$0xff]   ;;  %v1564_v43 = vld [vmem:[#allocation5 + $0xc4] ss:$8 sps:$4 sm:$0xff]  }
  0x43   :  { %707 = vmatprep.subr.bf16.mxu0 %v1522_v15  ;;  %747 = vmatpush1.bf16.msra.mxu1 %v1521_v16  ;;  %v1563_v44 = vld [vmem:[#allocation5 + $0x1d0] ss:$8 sps:$4 sm:$0xff]   ;;  %v1567_v45 = vld [vmem:[#allocation5 + $0x1c4] ss:$8 sps:$4 sm:$0xff]   ;;  %v1566_v47 = vld [vmem:[#allocation5 + $0xc0] ss:$8 sps:$4 sm:$0xff]  }
  0x44   :  { %748 = vmatprep.subr.bf16.mxu1 %v1525_v17  ;;  %v82_v46 = vld [vmem:[#allocation2 + $0x8] sm:$0xff]  ;;  %v84_v50 = vld [vmem:[#allocation2 + $0x18] sm:$0xff]  ;;  %v81_v4 = vld [vmem:[#allocation2] sm:$0xff]  ;;  %vm695_vm0 = vcmask 130048  }
  0x45   :  { %v89_v48 = vpack.c.bf16 %v82_v46, %v82_v46  ;;  %v1570_v49 = vld [vmem:[#allocation5 + $0xb4] ss:$8 sps:$4 sm:$0xff]   ;;  %v1569_v51 = vld [vmem:[#allocation5 + $0x1c0] ss:$8 sps:$4 sm:$0xff]   ;;  %v91_v52 = vpack.c.bf16 %v84_v50, %v84_v50  ;;  %v1572_v54 = vld [vmem:[#allocation5 + $0xb0] ss:$8 sps:$4 sm:$0xff]   ;;  %v88_v7 = vpack.c.bf16 %v81_v4, %v81_v4 }
  0x46   :  { %708 = vmatpush1.bf16.msra.mxu0 %v1524_v18  ;;  %v1573_v53 = vld [vmem:[#allocation5 + $0x1b4] ss:$8 sps:$4 sm:$0xff]   ;;  %v1576_v55 = vld [vmem:[#allocation5 + $0xa4] ss:$8 sps:$4 sm:$0xff]   ;;  %v1575_v56 = vld [vmem:[#allocation5 + $0x1b0] ss:$8 sps:$4 sm:$0xff]  }
  0x47   :  { %709 = vmatprep.subr.bf16.mxu0 %v1528_v19  ;;  %749 = vmatpush1.bf16.msra.mxu1 %v1527_v20  ;;  %v1579_v57 = vld [vmem:[#allocation5 + $0x1a4] ss:$8 sps:$4 sm:$0xff]   ;;  %v1578_v58 = vld [vmem:[#allocation5 + $0xa0] ss:$8 sps:$4 sm:$0xff]   ;;  %v1582_v59 = vld [vmem:[#allocation5 + $0x94] ss:$8 sps:$4 sm:$0xff]  }
  0x48   :  { %750 = vmatprep.subr.bf16.mxu1 %v1531_v21  ;;  %731 = vmatprep.mubr.bf16.mxu0 %v89_v48  ;;  %v1581_v60 = vld [vmem:[#allocation5 + $0x1a0] ss:$8 sps:$4 sm:$0xff]   ;;  %v1585_v61 = vld [vmem:[#allocation5 + $0x194] ss:$8 sps:$4 sm:$0xff]   ;;  %v1584_v62 = vld [vmem:[#allocation5 + $0x90] ss:$8 sps:$4 sm:$0xff]  }
  0x49   :  { %772 = vmatprep.mubr.bf16.mxu1 %v91_v52  ;;  %v1588_v63 = vld [vmem:[#allocation5 + $0x84] ss:$8 sps:$4 sm:$0xff]   ;;  %v1587_v0 = vld [vmem:[#allocation5 + $0x190] ss:$8 sps:$4 sm:$0xff]   ;;  %v1590_v1 = vld [vmem:[#allocation5 + $0x80] ss:$8 sps:$4 sm:$0xff]  }
  0x4a   :  { %710 = vmatpush1.bf16.msra.mxu0 %v1530_v22  ;;  %v1591_v2 = vld [vmem:[#allocation5 + $0x184] ss:$8 sps:$4 sm:$0xff]   ;;  %v1593_v3 = vld [vmem:[#allocation5 + $0x180] ss:$8 sps:$4 sm:$0xff]   ;;  %v1596_v5 = vld [vmem:[#allocation5 + $0x274] ss:$8 sps:$4 sm:$0xff]  }
  0x4b   :  { %711 = vmatprep.subr.bf16.mxu0 %v1534_v23  ;;  %751 = vmatpush1.bf16.msra.mxu1 %v1533_v24  ;;  %v83_v6 = vld [vmem:[#allocation2 + $0x10] sm:$0xff]  ;;  %v1599_v9 = vld [vmem:[#allocation5 + $0x264] ss:$8 sps:$4 sm:$0xff]   ;;  %v1639_v11 = vld [vmem:[#allocation5 + $0x300] ss:$8 sps:$4 sm:$0xff]   ;;  %v1829_v19 = vmov 0  }
  0x4c   :  { %752 = vmatprep.subr.bf16.mxu1 %v1537_v25  ;;  %v1594_v8 = vld [vmem:[#allocation5 + $0x270] ss:$8 sps:$4 sm:$0xff]   ;;  %v90_v10 = vpack.c.bf16 %v83_v6, %v83_v6  ;;  %v1641_v12 = vld [vmem:[#allocation5 + $0x304] ss:$8 sps:$4 sm:$0xff]   ;;  %v1597_v13 = vld [vmem:[#allocation5 + $0x260] ss:$8 sps:$4 sm:$0xff]  }
  0x4d   :  { %v1602_v14 = vld [vmem:[#allocation5 + $0x254] ss:$8 sps:$4 sm:$0xff]   ;;  %v1600_v18 = vld [vmem:[#allocation5 + $0x250] ss:$8 sps:$4 sm:$0xff]   ;;  %v1605_v20 = vld [vmem:[#allocation5 + $0x244] ss:$8 sps:$4 sm:$0xff]  }
  0x4e   :  { %712 = vmatpush1.bf16.msra.mxu0 %v1536_v26  ;;  %v87_v15 = vld [vmem:[#allocation2 + $0x30] sm:$0xff]  ;;  %v86_v16 = vld [vmem:[#allocation2 + $0x28] sm:$0xff]  ;;  %v1603_v22 = vld [vmem:[#allocation5 + $0x240] ss:$8 sps:$4 sm:$0xff]  }
  0x4f   :  { %713 = vmatprep.subr.bf16.mxu0 %v1540_v27  ;;  %753 = vmatpush1.bf16.msra.mxu1 %v1539_v28  ;;  %v93_v17 = vpack.c.bf16 %v86_v16, %v86_v16  ;;  %v94_v21 = vpack.c.bf16 %v87_v15, %v87_v15  ;;  %v1608_v23 = vld [vmem:[#allocation5 + $0x234] ss:$8 sps:$4 sm:$0xff]   ;;  %v1606_v24 = vld [vmem:[#allocation5 + $0x230] ss:$8 sps:$4 sm:$0xff]   ;;  %v1611_v25 = vld [vmem:[#allocation5 + $0x224] ss:$8 sps:$4 sm:$0xff]  }
  0x50   :  { %754 = vmatprep.subr.bf16.mxu1 %v1543_v29  ;;  %v1609_v26 = vld [vmem:[#allocation5 + $0x220] ss:$8 sps:$4 sm:$0xff]   ;;  %v1614_v27 = vld [vmem:[#allocation5 + $0x214] ss:$8 sps:$4 sm:$0xff]   ;;  %v1612_v28 = vld [vmem:[#allocation5 + $0x210] ss:$8 sps:$4 sm:$0xff]  }
  0x51   :  { %v1617_v29 = vld [vmem:[#allocation5 + $0x204] ss:$8 sps:$4 sm:$0xff]   ;;  %v1642_v46 = vld [vmem:[#allocation5 + $0x280] ss:$8 sps:$4 sm:$0xff]   ;;  %v1648_v52 = vld [vmem:[#allocation7 + $0x60] ss:$8 sps:$4 sm:$0xff]  }
  0x52   :  { %714 = vmatpush1.bf16.msra.mxu0 %v1542_v30  ;;  %v1615_v30 = vld [vmem:[#allocation5 + $0x200] ss:$8 sps:$4 sm:$0xff]   ;;  %v1647_v50 = vld [vmem:[#allocation7 + $0x74] ss:$8 sps:$4 sm:$0xff]   ;;  %v1672_v4 = vld [vmem:[#allocation7 + $0xe0] ss:$8 sps:$4 sm:$0xff]  }
  0x53   :  { %715 = vmatprep.subr.bf16.mxu0 %v1546_v31  ;;  %755 = vmatpush1.bf16.msra.mxu1 %v1545_v32  ;;  %v1620_v31 = vld [vmem:[#allocation5 + $0x2f4] ss:$8 sps:$4 sm:$0xff]   ;;  %v1618_v32 = vld [vmem:[#allocation5 + $0x2f0] ss:$8 sps:$4 sm:$0xff]   ;;  %v1675_v6 = vld [vmem:[#allocation7 + $0xd0] ss:$8 sps:$4 sm:$0xff]  }
  0x54   :  { %756 = vmatprep.subr.bf16.mxu1 %v1549_v33  ;;  %v1623_v33 = vld [vmem:[#allocation5 + $0x2e4] ss:$8 sps:$4 sm:$0xff]   ;;  %v1692_v15 = vld [vmem:[#allocation7 + $0x84] ss:$8 sps:$4 sm:$0xff]   ;;  %v1690_v16 = vld [vmem:[#allocation7 + $0x80] ss:$8 sps:$4 sm:$0xff]  }
  0x56   :  { %716 = vmatpush2.bf16.msra.mxu0 %v1548_v34  ;;  %v1621_v34 = vld [vmem:[#allocation5 + $0x2e0] ss:$8 sps:$4 sm:$0xff]  }
  0x57   :  { %717 = vmatprep.subr.bf16.mxu0 %v1552_v35  ;;  %757 = vmatpush2.bf16.msra.mxu1 %v1551_v36  ;;  %v1626_v35 = vld [vmem:[#allocation5 + $0x2d4] ss:$8 sps:$4 sm:$0xff]   ;;  %v1624_v36 = vld [vmem:[#allocation5 + $0x2d0] ss:$8 sps:$4 sm:$0xff]  }
  0x58   :  { %758 = vmatprep.subr.bf16.mxu1 %v1555_v37  ;;  %v1629_v37 = vld [vmem:[#allocation5 + $0x2c4] ss:$8 sps:$4 sm:$0xff]  }
  0x5a   :  { %718 = vmatpush2.bf16.msra.mxu0 %v1554_v38  ;;  %v1627_v38 = vld [vmem:[#allocation5 + $0x2c0] ss:$8 sps:$4 sm:$0xff]  }
  0x5b   :  { %719 = vmatprep.subr.bf16.mxu0 %v1558_v39  ;;  %759 = vmatpush2.bf16.msra.mxu1 %v1557_v40  ;;  %v1632_v39 = vld [vmem:[#allocation5 + $0x2b4] ss:$8 sps:$4 sm:$0xff]   ;;  %v1630_v40 = vld [vmem:[#allocation5 + $0x2b0] ss:$8 sps:$4 sm:$0xff]  }
  0x5c   :  { %760 = vmatprep.subr.bf16.mxu1 %v1561_v41  ;;  %v1635_v41 = vld [vmem:[#allocation5 + $0x2a4] ss:$8 sps:$4 sm:$0xff]  }
  0x5e   :  { %720 = vmatpush2.bf16.msra.mxu0 %v1560_v42  ;;  %v1633_v42 = vld [vmem:[#allocation5 + $0x2a0] ss:$8 sps:$4 sm:$0xff]  }
  0x5f   :  { %721 = vmatprep.subr.bf16.mxu0 %v1564_v43  ;;  %761 = vmatpush2.bf16.msra.mxu1 %v1563_v44  ;;  %v1638_v43 = vld [vmem:[#allocation5 + $0x294] ss:$8 sps:$4 sm:$0xff]   ;;  %v1636_v44 = vld [vmem:[#allocation5 + $0x290] ss:$8 sps:$4 sm:$0xff]  }
  0x60   :  { %762 = vmatprep.subr.bf16.mxu1 %v1567_v45  ;;  %v1644_v45 = vld [vmem:[#allocation5 + $0x284] ss:$8 sps:$4 sm:$0xff]  }
  0x62   :  { %722 = vmatpush2.bf16.msra.mxu0 %v1566_v47  ;;  %v85_v47 = vld [vmem:[#allocation2 + $0x20] sm:$0xff] }
  0x63   :  { %723 = vmatprep.subr.bf16.mxu0 %v1570_v49  ;;  %763 = vmatpush2.bf16.msra.mxu1 %v1569_v51  ;;  %v92_v48 = vpack.c.bf16 %v85_v47, %v85_v47  ;;  %v1645_v49 = vld [vmem:[#allocation7 + $0x70] ss:$8 sps:$4 sm:$0xff]   ;;  %v1650_v51 = vld [vmem:[#allocation7 + $0x64] ss:$8 sps:$4 sm:$0xff]  }
  0x64   :  { %764 = vmatprep.subr.bf16.mxu1 %v1573_v53  ;;  %v1653_v53 = vld [vmem:[#allocation7 + $0x54] ss:$8 sps:$4 sm:$0xff]  }
  0x66   :  { %724 = vmatpush2.bf16.msra.mxu0 %v1572_v54  ;;  %v1651_v54 = vld [vmem:[#allocation7 + $0x50] ss:$8 sps:$4 sm:$0xff]  }
  0x67   :  { %725 = vmatprep.subr.bf16.mxu0 %v1576_v55  ;;  %765 = vmatpush2.bf16.msra.mxu1 %v1575_v56  ;;  %v1656_v55 = vld [vmem:[#allocation7 + $0x44] ss:$8 sps:$4 sm:$0xff]   ;;  %v1654_v56 = vld [vmem:[#allocation7 + $0x40] ss:$8 sps:$4 sm:$0xff]  }
  0x68   :  { %766 = vmatprep.subr.bf16.mxu1 %v1579_v57  ;;  %v1659_v57 = vld [vmem:[#allocation7 + $0x34] ss:$8 sps:$4 sm:$0xff]  }
  0x6a   :  { %726 = vmatpush2.bf16.msra.mxu0 %v1578_v58  ;;  %v1657_v58 = vld [vmem:[#allocation7 + $0x30] ss:$8 sps:$4 sm:$0xff]  }
  0x6b   :  { %727 = vmatprep.subr.bf16.mxu0 %v1582_v59  ;;  %767 = vmatpush2.bf16.msra.mxu1 %v1581_v60  ;;  %v1662_v59 = vld [vmem:[#allocation7 + $0x24] ss:$8 sps:$4 sm:$0xff]   ;;  %v1660_v60 = vld [vmem:[#allocation7 + $0x20] ss:$8 sps:$4 sm:$0xff]  }
  0x6c   :  { %768 = vmatprep.subr.bf16.mxu1 %v1585_v61  ;;  %v1665_v61 = vld [vmem:[#allocation7 + $0x14] ss:$8 sps:$4 sm:$0xff]  }
  0x6e   :  { %728 = vmatpush2.bf16.msra.mxu0 %v1584_v62  ;;  %v1663_v62 = vld [vmem:[#allocation7 + $0x10] ss:$8 sps:$4 sm:$0xff]  }
  0x6f   :  { %729 = vmatprep.subr.bf16.mxu0 %v1588_v63  ;;  %769 = vmatpush2.bf16.msra.mxu1 %v1587_v0  ;;  %v1668_v63 = vld [vmem:[#allocation7 + $0x4] ss:$8 sps:$4 sm:$0xff]   ;;  %v1666_v0 = vld [vmem:[#allocation7] ss:$8 sps:$4 sm:$0xff]  }
  0x70   :  { %770 = vmatprep.subr.bf16.mxu1 %v1591_v2  ;;  %v1669_v2 = vld [vmem:[#allocation7 + $0xf0] ss:$8 sps:$4 sm:$0xff]  }
  0x72   :  { %730 = vmatpush2.bf16.msra.mxu0 %v1590_v1  ;;  %v1671_v1 = vld [vmem:[#allocation7 + $0xf4] ss:$8 sps:$4 sm:$0xff]  }
  0x73   :  { %781 = vmatprep.subr.bf16.mxu0 %v1596_v5  ;;  %771 = vmatpush2.bf16.msra.mxu1 %v1593_v3  ;;  %v1674_v3 = vld [vmem:[#allocation7 + $0xe4] ss:$8 sps:$4 sm:$0xff]   ;;  %v1677_v5 = vld [vmem:[#allocation7 + $0xd4] ss:$8 sps:$4 sm:$0xff]  }
  0x74   :  { %836 = vmatprep.subr.bf16.mxu1 %v1641_v12  ;;  %v1684_v12 = vld [vmem:[#allocation7 + $0xa0] ss:$8 sps:$4 sm:$0xff]  }
  0x75   :  { %732 = vmatmul.mubr.bf16.vlgmr.msra.gmra.mxu0 %v88_v7  ;;  %v1680_v7 = vld [vmem:[#allocation7 + $0xc4] ss:$8 sps:$4 sm:$0xff]  }
  0x76   :  { %782 = vmatpush1.bf16.msra.mxu0 %v1594_v8  ;;  %773 = vmatmul.mubr.bf16.vlgmr.msra.gmra.mxu1 %v90_v10  ;;  %v1678_v8 = vld [vmem:[#allocation7 + $0xc0] ss:$8 sps:$4 sm:$0xff]   ;;  %v1681_v10 = vld [vmem:[#allocation7 + $0xb0] ss:$8 sps:$4 sm:$0xff]  }
  0x77   :  { %783 = vmatprep.subr.bf16.mxu0 %v1599_v9  ;;  %837 = vmatpush1.bf16.msra.mxu1 %v1639_v11  ;;  %v1683_v9 = vld [vmem:[#allocation7 + $0xb4] ss:$8 sps:$4 sm:$0xff]   ;;  %v1686_v11 = vld [vmem:[#allocation7 + $0xa4] ss:$8 sps:$4 sm:$0xff]  }
  0x78   :  { %854 = vmatprep.mubr.bf16.mxu1 %v1829_v19  ;;  %813 = vmatprep.mubr.bf16.mxu0 %v93_v17  ;;  %v1693_v17 = vld [vmem:[#allocation8 + $0x78] sm:$0xff]   ;;  %v1695_v19 = vld [vmem:[#allocation8 + $0x70] sm:$0xff]  }
  0x79   :  { %1071 = vmatprep.subr.bf16.mxu1 %v1647_v50 }
  0x7a   :  { %784 = vmatpush1.bf16.msra.mxu0 %v1597_v13  ;;  %v1689_v13 = vld [vmem:[#allocation7 + $0x94] ss:$8 sps:$4 sm:$0xff]  }
  0x7b   :  { %785 = vmatprep.subr.bf16.mxu0 %v1602_v14  ;;  %v1687_v14 = vld [vmem:[#allocation7 + $0x90] ss:$8 sps:$4 sm:$0xff]  }
  0x7e   :  { %786 = vmatpush1.bf16.msra.mxu0 %v1600_v18  ;;  %1416 = vmatmul.mubr.msk.bf16.vlgmr.msra.gmra.mxu1 %vm695_vm0, %v94_v21  ;;  %v1694_v18 = vld [vmem:[#allocation8 + $0x38] sm:$0xff]   ;;  %v1697_v21 = vld [vmem:[#allocation8 + $0x68] sm:$0xff]  }
  0x7f   :  { %787 = vmatprep.subr.bf16.mxu0 %v1605_v20  ;;  %1072 = vmatpush1.bf16.msra.mxu1 %v1645_v49  ;;  %v1696_v20 = vld [vmem:[#allocation8 + $0x30] sm:$0xff]  }
  0x80   :  { %1073 = vmatprep.subr.bf16.mxu1 %v1650_v51 }
  0x82   :  { %788 = vmatpush1.bf16.msra.mxu0 %v1603_v22  ;;  %v1698_v22 = vld [vmem:[#allocation8 + $0x28] sm:$0xff]  }
  0x83   :  { %789 = vmatprep.subr.bf16.mxu0 %v1608_v23  ;;  %1074 = vmatpush1.bf16.msra.mxu1 %v1648_v52  ;;  %v1699_v23 = vld [vmem:[#allocation8 + $0x60] sm:$0xff]  }
  0x84   :  { %1075 = vmatprep.subr.bf16.mxu1 %v1653_v53 }
  0x86   :  { %790 = vmatpush1.bf16.msra.mxu0 %v1606_v24  ;;  %v1700_v24 = vld [vmem:[#allocation8 + $0x20] sm:$0xff]  }
  0x87   :  { %791 = vmatprep.subr.bf16.mxu0 %v1611_v25  ;;  %1076 = vmatpush1.bf16.msra.mxu1 %v1651_v54  ;;  %v1701_v25 = vld [vmem:[#allocation8 + $0x58] sm:$0xff]  }
  0x88   :  { %1077 = vmatprep.subr.bf16.mxu1 %v1656_v55 }
  0x8a   :  { %792 = vmatpush1.bf16.msra.mxu0 %v1609_v26  ;;  %v1702_v26 = vld [vmem:[#allocation8 + $0x18] sm:$0xff]  }
  0x8b   :  { %793 = vmatprep.subr.bf16.mxu0 %v1614_v27  ;;  %1078 = vmatpush1.bf16.msra.mxu1 %v1654_v56  ;;  %v1703_v27 = vld [vmem:[#allocation8 + $0x50] sm:$0xff]  }
  0x8c   :  { %1079 = vmatprep.subr.bf16.mxu1 %v1659_v57 }
  0x8e   :  { %794 = vmatpush1.bf16.msra.mxu0 %v1612_v28  ;;  %v1704_v28 = vld [vmem:[#allocation8 + $0x10] sm:$0xff]  }
  0x8f   :  { %795 = vmatprep.subr.bf16.mxu0 %v1617_v29  ;;  %1080 = vmatpush1.bf16.msra.mxu1 %v1657_v58 }
  0x90   :  { %1081 = vmatprep.subr.bf16.mxu1 %v1662_v59 }
  0x92   :  { %796 = vmatpush1.bf16.msra.mxu0 %v1615_v30 }
  0x93   :  { %797 = vmatprep.subr.bf16.mxu0 %v1620_v31  ;;  %1082 = vmatpush1.bf16.msra.mxu1 %v1660_v60 }
  0x94   :  { %1083 = vmatprep.subr.bf16.mxu1 %v1665_v61 }
  0x96   :  { %798 = vmatpush2.bf16.msra.mxu0 %v1618_v32 }
  0x97   :  { %799 = vmatprep.subr.bf16.mxu0 %v1623_v33  ;;  %1084 = vmatpush1.bf16.msra.mxu1 %v1663_v62 }
  0x98   :  { %1085 = vmatprep.subr.bf16.mxu1 %v1668_v63 }
  0x9a   :  { %800 = vmatpush2.bf16.msra.mxu0 %v1621_v34 }
  0x9b   :  { %801 = vmatprep.subr.bf16.mxu0 %v1626_v35  ;;  %1086 = vmatpush1.bf16.msra.mxu1 %v1666_v0  ;;  %v1705_v0 = vld [vmem:[#allocation8 + $0x48] sm:$0xff]  }
  0x9c   :  { %1087 = vmatprep.subr.bf16.mxu1 %v1671_v1  ;;  %v1706_v1 = vld [vmem:[#allocation8 + $0x8] sm:$0xff]  }
  0x9e   :  { %802 = vmatpush2.bf16.msra.mxu0 %v1624_v36 }
  0x9f   :  { %803 = vmatprep.subr.bf16.mxu0 %v1629_v37  ;;  %1088 = vmatpush2.bf16.msra.mxu1 %v1669_v2  ;;  %v1707_v2 = vld [vmem:[#allocation8 + $0x40] sm:$0xff]  }
  0xa0   :  { %1089 = vmatprep.subr.bf16.mxu1 %v1674_v3  ;;  %v1708_v3 = vld [vmem:[#allocation8] sm:$0xff]  }
  0xa2   :  { %804 = vmatpush2.bf16.msra.mxu0 %v1627_v38 }
  0xa3   :  { %805 = vmatprep.subr.bf16.mxu0 %v1632_v39  ;;  %1090 = vmatpush2.bf16.msra.mxu1 %v1672_v4  ;;  %v899_v4 = vld [vmem:[%s1899_s4] sm:$0x3]  ;;  %s1830_s4 = smov [#allocation10]  }
  0xa4   :  { %1091 = vmatprep.subr.bf16.mxu1 %v1677_v5  ;;  %s1307_s26 = sshll.u32 %s1830_s4, 4  ;;  %s1308_s26 = int_to_ptr.vmem [resolvable:$true] %s1307_s26 }
  0xa5   :  { %p1798_p7 = scmp.lt.s32.totalorder %s1308_s26, %s1308_s26 }
  0xa6   :  { %806 = vmatpush2.bf16.msra.mxu0 %v1630_v40 }
  0xa7   :  { %807 = vmatprep.subr.bf16.mxu0 %v1635_v41  ;;  %1092 = vmatpush2.bf16.msra.mxu1 %v1675_v6  ;;  %v195_v41 = vlaneseq }
  0xa8   :  { %1093 = vmatprep.subr.bf16.mxu1 %v1680_v7 }
  0xaa   :  { %808 = vmatpush2.bf16.msra.mxu0 %v1633_v42  ;;  %v196_v42 = vshrl.u32 %v195_v41, 7 }
  0xab   :  { %809 = vmatprep.subr.bf16.mxu0 %v1638_v43  ;;  %1094 = vmatpush2.bf16.msra.mxu1 %v1678_v8 }
  0xac   :  { %1095 = vmatprep.subr.bf16.mxu1 %v1683_v9  ;;  %v197_v43 = vsub.s32 0, %v196_v42 }
  0xae   :  { %810 = vmatpush2.bf16.msra.mxu0 %v1636_v44  ;;  %v193_v44 = vld [vmem:[%s1897_s2] sm:$0x3]  ;;  %v904_v5 = vrot.slane %v899_v4, %v197_v43 }
  0xaf   :  { %811 = vmatprep.subr.bf16.mxu0 %v1644_v45  ;;  %1096 = vmatpush2.bf16.msra.mxu1 %v1681_v10  ;;  %v201_v45 = vsub.s32 1, %v196_v42 }
  0xb0   :  { %1097 = vmatprep.subr.bf16.mxu1 %v1686_v11 }
  0xb1   :  { %v202_v47 = vrot.slane %v193_v44, %v201_v45  ;;  %v908_v6 = vrot.slane %v899_v4, %v201_v45 }
  0xb2   :  { %812 = vmatpush2.bf16.msra.mxu0 %v1642_v46  ;;  %v198_v46 = vrot.slane %v193_v44, %v197_v43 }
  0xb3   :  { %1098 = vmatpush2.bf16.msra.mxu1 %v1684_v12  ;;  %1466 = vmatprep.subr.bf16.mxu0 %v1693_v17 }
  0xb4   :  { %1099 = vmatprep.subr.bf16.mxu1 %v1689_v13 }
  0xb5   :  { %814 = vmatmul.mubr.bf16.vlgmr.msra.gmra.mxu0 %v92_v48 }
  0xb6   :  { %1467 = vmatpush3.bf16.msra.mxu0 %v1694_v18 }
  0xb7   :  { %1100 = vmatpush2.bf16.msra.mxu1 %v1687_v14  ;;  %1468 = vmatprep.subr.bf16.mxu0 %v1695_v19  ;;  %v1449_v19 = vld [vmem:[%s1901_s6] ss:$0 sm:$0xff]  ;;  %s1793_s6 = scalar_lea.vmem %s1308_s26, 128 }
  0xb8   :  { %1101 = vmatprep.subr.bf16.mxu1 %v1692_v15  ;;  %p1794_p6 = scmp.ne.s32.totalorder %s1308_s26, %s1793_s6  ;;  %p1799_p8 = scmp.lt.s32.totalorder %s1793_s6, %s1793_s6 }
  0xba   :  { %1469 = vmatpush3.bf16.msra.mxu0 %v1696_v20  ;;  %p1800_p9 = por %p1799_p8, %p1798_p7 }
  0xbb   :  { %1102 = vmatpush2.bf16.msra.mxu1 %v1690_v16  ;;  %1470 = vmatprep.subr.bf16.mxu0 %v1697_v21 }
  0xbc   :  { %p1801_p10 = pnand %p1800_p9, %p1794_p6 }
  0xbe   :  { %1471 = vmatpush3.bf16.msra.mxu0 %v1698_v22 }
  0xbf   :  { %1472 = vmatprep.subr.bf16.mxu0 %v1699_v23 }
  0xc2   :  { %1473 = vmatpush3.bf16.msra.mxu0 %v1700_v24 }
  0xc3   :  { %1474 = vmatprep.subr.bf16.mxu0 %v1701_v25 }
  0xc6   :  { %1475 = vmatpush3.bf16.msra.mxu0 %v1702_v26 }
  0xc7   :  { %1476 = vmatprep.subr.bf16.mxu0 %v1703_v27 }
  0xca   :  { %1477 = vmatpush3.bf16.msra.mxu0 %v1704_v28 }
  0xcb   :  { %1478 = vmatprep.subr.bf16.mxu0 %v1705_v0 }
  0xce   :  { %1479 = vmatpush3.bf16.msra.mxu0 %v1706_v1 }
  0xcf   :  { %1480 = vmatprep.subr.bf16.mxu0 %v1707_v2 }
  0xd2   :  { %1481 = vmatpush3.bf16.msra.mxu0 %v1708_v3 }
 0x135   :  { %v733_v29 = vpop.f32.mrf.mxu0 }
 0x136   :  { %v774_v31 = vpop.f32.mrf.mxu1  ;;  %v734_v48 = vadd.f32 %v733_v29, %v198_v46 }
 0x137   :  { %v735_v30 = vpop.f32.mrf.mxu0 }
 0x138   :  { %v776_v33 = vpop.f32.mrf.mxu1  ;;  %v736_v49 = vadd.f32 %v735_v30, %v202_v47  ;;  %v775_v50 = vadd.f32 %v774_v31, %v734_v48 }
 0x139   :  { %v737_v32 = vpop.f32.mrf.mxu0 }
 0x13a   :  { %v778_v35 = vpop.f32.mrf.mxu1  ;;  %v777_v52 = vadd.f32 %v776_v33, %v736_v49 }
 0x13b   :  { %v738_v34 = vpop.f32.mrf.mxu0 }
 0x13c   :  { %v779_v36 = vpop.f32.mrf.mxu1 }
 0x13e   :  { %v856_v37 = vpop.f32.mrf.mxu1 }
 0x140   :  { %v858_v38 = vpop.f32.mrf.mxu1 }
 0x142   :  { %v860_v39 = vpop.f32.mrf.mxu1 }
 0x144   :  { %v861_v40 = vpop.f32.mrf.mxu1 }
 0x175   :  { %v815_v51 = vpop.f32.mrf.mxu0 }
 0x176   :  { %v816_v53 = vadd.f32 %v815_v51, %v775_v50 }
 0x177   :  { %v817_v54 = vpop.f32.mrf.mxu0 }
 0x178   :  { %v857_v55 = vadd.f32 %v856_v37, %v816_v53  ;;  %v818_v56 = vadd.f32 %v817_v54, %v777_v52 }
 0x179   :  { %v819_v57 = vpop.f32.mrf.mxu0 }
 0x17a   :  { %v859_v58 = vadd.f32 %v858_v38, %v818_v56  ;;  %v863_v59 = vmax.f32 %v857_v55, 0.0 }
 0x17b   :  { %v820_v60 = vpop.f32.mrf.mxu0 }
 0x17c   :  { %v864_v61 = vmax.f32 %v859_v58, 0.0  ;;  %v865_v63 = vpack.c.bf16 %v863_v59, %v863_v59 }
 0x17e   :  { %v866_v62 = vpack.c.bf16 %v864_v61, %v864_v61 }
 0x180   :  { %1103 = vmatprep.mubr.bf16.mxu1 %v866_v62 }
 0x181   :  { %1104 = vmatmul.mubr.bf16.vlgmr.msra.gmra.mxu1 %v865_v63 }
 0x241   :  { %v1105_v7 = vpop.f32.mrf.mxu1 }
 0x242   :  { %v1106_v8 = vadd.f32 %v1105_v7, %v904_v5 }
 0x243   :  { %v1107_v9 = vpop.f32.mrf.mxu1 }
 0x244   :  { %v1108_v10 = vadd.f32 %v1107_v9, %v908_v6  ;;  %v1112_v11 = vmax.f32 %v1106_v8, 0.0 }
 0x245   :  { %v1109_v12 = vpop.f32.mrf.mxu1 }
 0x246   :  { %v1113_v13 = vmax.f32 %v1108_v10, 0.0  ;;  %v1114_v16 = vpack.c.bf16 %v1112_v11, %v1112_v11 }
 0x247   :  { %v1110_v14 = vpop.f32.mrf.mxu1 }
 0x248   :  { %v1115_v15 = vpack.c.bf16 %v1113_v13, %v1113_v13 }
 0x24a   :  { %1283 = vmatprep.mubr.bf16.mxu0 %v1115_v15 }
 0x24b   :  { %1284 = vmatmul.mubr.bf16.vlgmr.msra.gmra.mxu0 %v1114_v16 }
 0x30b   :  { %v1482_v17 = vpop.f32.mrf.mxu0 }
 0x30d   :  { %v1483_v18 = vpop.f32.mrf.mxu0 }
 0x30e   :  { %v1484_v20 = vadd.f32 %v1483_v18, %v1482_v17 }
 0x30f   :  { %v1485_v21 = vpop.f32.mrf.mxu0 }
 0x310   :  { %v1286_v22 = vadd.f32 %v1484_v20, %v1449_v19 }
 0x311   :  { %v1486_v23 = vpop.f32.mrf.mxu0 }
 0x312   :  { %1291 = vmax.xlane.f32.xlu0 %v1286_v22 }
 0x39b   :  { %v1292_v24 = vpop.xlane.xlu0 %1291 }
 0x39c   :  { %v1293_v25 = vsub.f32 %v1286_v22, %v1292_v24 }
 0x39e   :  { %v1294_v26 = vmul.f32 1.442695, %v1293_v25 }
 0x3a0   :  { %1709 = vpow2.f32 %v1294_v26 }
 0x3ad   :  { %v1710_v27 = vpop.eup %1709 }
 0x3ae   :  { %1296 = vadd.xlane.f32.xlu0 %v1710_v27 }
 0x437   :  { %v1297_v28 = vpop.xlane.xlu0 %1296 }
 0x438   :  { %1711 = vrcp.f32 %v1297_v28 }
 0x445   :  { %v1712_v29 = vpop.eup %1711 }
 0x446   :  { %v1299_v30 = vmul.f32 %v1712_v29, %v1710_v27 }
 0x448   :  { %1300 = vst [vmem:[#allocation10] sm:$0xff] %v1299_v30 }
 0x449   :  { %1804 = shalt.err (!%p1801_p10)
}
 0x44a   :  { %1310 = dma.vmem_to_hbm [thread:$0]  %s1308_s26, 128, %s1902_s7, [#allocation4]  }
 0x44b   :  { %1819 = dma.done.wait [#allocation4], 128  }
 0x44c   :  { %1820 = vsyncadd [#allocation4], 4294967168 }
 0x44d   :  { %1314 = vsyncpa [#allocation3], 1 }
 0x44e   :  { %1315 = vsyncpa [#allocation6], 1 }
 0x44f   :  { %1316 = vsyncpa [#allocation9], 1 }
 0x450   :  { %1317 = vsyncpa [#allocation4], 1 }

</bundles_post_ra>
